<compile_context>
chip_gen: v5e
topology: v5e:2x2
jax: 0.10.0
libtpu: 0.0.40
codegen_flags: <defaults>
</compile_context>

<pallas_src>
import jax
import jax.numpy as jnp
from jax.experimental import pallas as pl
from jax.experimental.pallas import tpu as pltpu


def _round_up(x, m):
    return (x + m - 1) // m * m


def _mlp_kernel(x_ref, w1_ref, b1_ref, w2_ref, b2_ref, w3_ref, b3_ref,
                w4_ref, b4_ref, o_ref):
    # x_ref:  (tm, Dp)  one batch tile, f32 (lane-padded input features)
    # wN_ref: (K, N)    padded weights, (in, out) layout, bf16
    # bN_ref: (1, N)    padded biases, f32
    # o_ref:  (tm, Cp)  lane-padded output tile, f32
    cdt = w1_ref.dtype  # bf16 operands to the MXU

    h = x_ref[...].astype(cdt)
    h = jnp.dot(h, w1_ref[...], preferred_element_type=jnp.float32) + b1_ref[...]
    h = jnp.maximum(h, 0.0).astype(cdt)          # bias-add / ReLU in f32, recast

    h = jnp.dot(h, w2_ref[...], preferred_element_type=jnp.float32) + b2_ref[...]
    h = jnp.maximum(h, 0.0).astype(cdt)

    h = jnp.dot(h, w3_ref[...], preferred_element_type=jnp.float32) + b3_ref[...]
    h = jnp.maximum(h, 0.0).astype(cdt)

    o = jnp.dot(h, w4_ref[...], preferred_element_type=jnp.float32) + b4_ref[...]
    o_ref[...] = o.astype(o_ref.dtype)


def prepare_params(params, *, matmul_dtype=jnp.bfloat16):
    """One-time (load-time) transpose + zero-pad + cast of the weights.

    params: ((w1,b1),(w2,b2),(w3,b3),(w4,b4)) in PyTorch Linear layout
            (weight: (out, in), bias: (out,)).
    Returns (padded_arrays, dims) to be passed to mlp_forward.
    """
    (w1, b1), (w2, b2), (w3, b3), (w4, b4) = params
    Din, H, C = w1.shape[1], w1.shape[0], w4.shape[0]
    Dp, Hp, Cp = _round_up(Din, 128), _round_up(H, 128), _round_up(C, 128)

    def pad_w(w, k_pad, n_pad):
        # PyTorch (out, in) -> (in, out), zero-padded, cast to bf16 for the MXU.
        wt = jnp.transpose(w).astype(jnp.float32)
        wt = jnp.pad(wt, ((0, k_pad - wt.shape[0]), (0, n_pad - wt.shape[1])))
        return wt.astype(matmul_dtype)

    def pad_b(b, n_pad):
        return jnp.pad(b.astype(jnp.float32), (0, n_pad - b.shape[0])).reshape(1, n_pad)

    padded = (pad_w(w1, Dp, Hp), pad_b(b1, Hp),
              pad_w(w2, Hp, Hp), pad_b(b2, Hp),
              pad_w(w3, Hp, Hp), pad_b(b3, Hp),
              pad_w(w4, Hp, Cp), pad_b(b4, Cp))
    dims = {"Din": Din, "H": H, "C": C, "Dp": Dp, "Hp": Hp, "Cp": Cp}
    return padded, dims


def _physical_vmem_bytes():
    try:
        return int(pltpu.get_tpu_info().vmem_capacity_bytes)
    except Exception:
        return 128 << 20  # conservative fallback (v5e/v6e physical)


def _vmem_limit_bytes(tm, Dp, Hp, Cp, w_dtype):
    wb = jnp.dtype(w_dtype).itemsize
    weights = (Dp * Hp + 2 * Hp * Hp + Hp * Cp) * wb      # single-buffered (Buffered(1))
    biases = (3 * Hp + Cp) * 4
    io = 2 * tm * Dp * 4 + 2 * tm * Cp * 4                # double-buffered x / out tiles
    acts = 3 * tm * Hp * 4                                # live f32/bf16 intermediates
    total = weights + biases + io + acts
    limit = max(int(total * 1.5) + (8 << 20), 32 << 20)   # headroom + compiler scratch
    cap = int(_physical_vmem_bytes() * 0.85)              # ~110 MiB v5e/v6e, ~54 MiB v7x
    return min(limit, cap)


def mlp_forward(x, prepared, *, block_rows=512):
    """MLP forward: out = L4(relu(L3(relu(L2(relu(L1(x))))))).

    x:        (B, input_size) float32
    prepared: result of prepare_params(params)  (padded bf16 weights, f32 biases)
    """
    padded, dims = prepared
    Din, C = dims["Din"], dims["C"]
    Dp, Hp, Cp = dims["Dp"], dims["Hp"], dims["Cp"]

    B = x.shape[0]
    assert x.shape[1] == Din, (x.shape, Din)

    block_rows = max(8, _round_up(block_rows, 8))
    Bp = _round_up(B, 8)
    tm = min(block_rows, Bp)
    # Guarantee >= 2 grid steps when the batch allows, so the "parallel" batch
    # axis shards across both TensorCores (v7x megacore).
    if Bp >= 16:
        tm = min(tm, _round_up((Bp + 1) // 2, 8))
    Bp = _round_up(Bp, tm)

    x_p = jnp.pad(x.astype(jnp.float32), ((0, Bp - B), (0, Dp - Din)))

    # Weights/biases have a constant index_map -> VMEM-resident, single-buffered.
    resident = lambda shape: pl.BlockSpec(shape, lambda i: (0, 0),
                                          pipeline_mode=pl.Buffered(1))

    out_p = pl.pallas_call(
        _mlp_kernel,
        out_shape=jax.ShapeDtypeStruct((Bp, Cp), jnp.float32),
        grid_spec=pltpu.PrefetchScalarGridSpec(
            num_scalar_prefetch=0,
            grid=(Bp // tm,),
            in_specs=[
                pl.BlockSpec((tm, Dp), lambda i: (i, 0)),      # x tile (pipelined)
                resident((Dp, Hp)), resident((1, Hp)),         # layer 1
                resident((Hp, Hp)), resident((1, Hp)),         # layer 2
                resident((Hp, Hp)), resident((1, Hp)),         # layer 3
                resident((Hp, Cp)), resident((1, Cp)),         # layer 4
            ],
            out_specs=pl.BlockSpec((tm, Cp), lambda i: (i, 0)),
        ),
        compiler_params=pltpu.CompilerParams(
            dimension_semantics=("parallel",),
            vmem_limit_bytes=_vmem_limit_bytes(tm, Dp, Hp, Cp, padded[0].dtype)),
    )(x_p, *padded)

    return out_p[:B, :C]


def _reference(x, params):
    (w1, b1), (w2, b2), (w3, b3), (w4, b4) = params
    h = jnp.maximum(x @ w1.T + b1, 0.0)
    h = jnp.maximum(h @ w2.T + b2, 0.0)
    h = jnp.maximum(h @ w3.T + b3, 0.0)
    return h @ w4.T + b4


if __name__ == "__main__":
    # MLP(input_size=16, common_size=4) -> hidden_num = 32, batch = 8.
    # (Tiny test shapes: the kernel is launch/DMA-overhead bound here; the
    #  tuning above only pays off at realistic B / hidden sizes.)
    B, INPUT_SIZE, COMMON_SIZE = 8, 16, 4
    HIDDEN = int(INPUT_SIZE * 2)

    key = jax.random.PRNGKey(0)
    ks = jax.random.split(key, 9)

    def init_linear(kw, kb, fan_in, fan_out):
        bound = 1.0 / jnp.sqrt(fan_in)
        w = jax.random.uniform(kw, (fan_out, fan_in), jnp.float32, -bound, bound)
        b = jax.random.uniform(kb, (fan_out,), jnp.float32, -bound, bound)
        return w, b

    x = jax.random.normal(ks[0], (B, INPUT_SIZE), dtype=jnp.float32)
    params = (
        init_linear(ks[1], ks[2], INPUT_SIZE, HIDDEN),
        init_linear(ks[3], ks[4], HIDDEN, HIDDEN),
        init_linear(ks[5], ks[6], HIDDEN, HIDDEN),
        init_linear(ks[7], ks[8], HIDDEN, COMMON_SIZE),
    )

    prepared = prepare_params(params)   # one-time transpose / pad / bf16 cast
    out = mlp_forward(x, prepared)
    out = jax.block_until_ready(out)

    ref = _reference(x, params)
    assert out.shape == (B, COMMON_SIZE), out.shape
    # bf16 MXU operands (f32 accumulation) -> relaxed tolerance vs f32 reference.
    assert jnp.allclose(out, ref, atol=2e-2, rtol=2e-2), "mismatch vs reference"

    print("KERNEL_OK")
</pallas_src>

<mosaic_0001>
module attributes {stable_mosaic.version = 11 : i64} {
  func.func @_mlp_kernel(%arg0: i32, %arg1: memref<8x128xf32, #tpu.memory_space<vmem>>, %arg2: memref<128x128xbf16, #tpu.memory_space<vmem>>, %arg3: memref<1x128xf32, #tpu.memory_space<vmem>>, %arg4: memref<128x128xbf16, #tpu.memory_space<vmem>>, %arg5: memref<1x128xf32, #tpu.memory_space<vmem>>, %arg6: memref<128x128xbf16, #tpu.memory_space<vmem>>, %arg7: memref<1x128xf32, #tpu.memory_space<vmem>>, %arg8: memref<128x128xbf16, #tpu.memory_space<vmem>>, %arg9: memref<1x128xf32, #tpu.memory_space<vmem>>, %arg10: memref<8x128xf32, #tpu.memory_space<vmem>>) attributes {dimension_semantics = [#tpu.dimension_semantics<parallel>], iteration_bounds = array<i64: 1>, scalar_prefetch = 0 : i64, scratch_operands = 0 : i64, tpu.core_type = #tpu.core_type<tc>, window_params = [{transform_indices = @transform_0, window_bounds = array<i64: 8, 128>}, {pipeline_mode = #tpu.pipeline_mode<synchronous>, transform_indices = @transform_1, window_bounds = array<i64: 128, 128>}, {pipeline_mode = #tpu.pipeline_mode<synchronous>, transform_indices = @transform_2, window_bounds = array<i64: 1, 128>}, {pipeline_mode = #tpu.pipeline_mode<synchronous>, transform_indices = @transform_3, window_bounds = array<i64: 128, 128>}, {pipeline_mode = #tpu.pipeline_mode<synchronous>, transform_indices = @transform_4, window_bounds = array<i64: 1, 128>}, {pipeline_mode = #tpu.pipeline_mode<synchronous>, transform_indices = @transform_5, window_bounds = array<i64: 128, 128>}, {pipeline_mode = #tpu.pipeline_mode<synchronous>, transform_indices = @transform_6, window_bounds = array<i64: 1, 128>}, {pipeline_mode = #tpu.pipeline_mode<synchronous>, transform_indices = @transform_7, window_bounds = array<i64: 128, 128>}, {pipeline_mode = #tpu.pipeline_mode<synchronous>, transform_indices = @transform_8, window_bounds = array<i64: 1, 128>}, {transform_indices = @transform_9, window_bounds = array<i64: 8, 128>}]} {
    %c0 = arith.constant 0 : index
    %c0_0 = arith.constant 0 : index
    %0 = vector.load %arg1[%c0, %c0_0] : memref<8x128xf32, #tpu.memory_space<vmem>>, vector<8x128xf32>
    %1 = arith.truncf %0 : vector<8x128xf32> to vector<8x128xbf16>
    %c0_1 = arith.constant 0 : index
    %c0_2 = arith.constant 0 : index
    %2 = vector.load %arg2[%c0_1, %c0_2] : memref<128x128xbf16, #tpu.memory_space<vmem>>, vector<128x128xbf16>
    %cst = arith.constant dense<0.000000e+00> : vector<8x128xf32>
    %3 = tpu.matmul %1, %2, %cst {dimension_numbers = #tpu.dot_dimension_numbers<[1], [0], [0], [1], [0, 0, 1, 1], [], []>} : vector<8x128xbf16>, vector<128x128xbf16>, vector<8x128xf32> -> vector<8x128xf32>
    %c0_3 = arith.constant 0 : index
    %c0_4 = arith.constant 0 : index
    %4 = vector.load %arg3[%c0_3, %c0_4] : memref<1x128xf32, #tpu.memory_space<vmem>>, vector<1x128xf32>
    %5 = vector.broadcast %4 : vector<1x128xf32> to vector<8x128xf32>
    %6 = arith.addf %3, %5 : vector<8x128xf32>
    %cst_5 = arith.constant 0.000000e+00 : f32
    %7 = vector.broadcast %cst_5 : f32 to vector<8x128xf32>
    %8 = arith.maximumf %6, %7 : vector<8x128xf32>
    %9 = arith.truncf %8 : vector<8x128xf32> to vector<8x128xbf16>
    %c0_6 = arith.constant 0 : index
    %c0_7 = arith.constant 0 : index
    %10 = vector.load %arg4[%c0_6, %c0_7] : memref<128x128xbf16, #tpu.memory_space<vmem>>, vector<128x128xbf16>
    %cst_8 = arith.constant dense<0.000000e+00> : vector<8x128xf32>
    %11 = tpu.matmul %9, %10, %cst_8 {dimension_numbers = #tpu.dot_dimension_numbers<[1], [0], [0], [1], [0, 0, 1, 1], [], []>} : vector<8x128xbf16>, vector<128x128xbf16>, vector<8x128xf32> -> vector<8x128xf32>
    %c0_9 = arith.constant 0 : index
    %c0_10 = arith.constant 0 : index
    %12 = vector.load %arg5[%c0_9, %c0_10] : memref<1x128xf32, #tpu.memory_space<vmem>>, vector<1x128xf32>
    %13 = vector.broadcast %12 : vector<1x128xf32> to vector<8x128xf32>
    %14 = arith.addf %11, %13 : vector<8x128xf32>
    %cst_11 = arith.constant 0.000000e+00 : f32
    %15 = vector.broadcast %cst_11 : f32 to vector<8x128xf32>
    %16 = arith.maximumf %14, %15 : vector<8x128xf32>
    %17 = arith.truncf %16 : vector<8x128xf32> to vector<8x128xbf16>
    %c0_12 = arith.constant 0 : index
    %c0_13 = arith.constant 0 : index
    %18 = vector.load %arg6[%c0_12, %c0_13] : memref<128x128xbf16, #tpu.memory_space<vmem>>, vector<128x128xbf16>
    %cst_14 = arith.constant dense<0.000000e+00> : vector<8x128xf32>
    %19 = tpu.matmul %17, %18, %cst_14 {dimension_numbers = #tpu.dot_dimension_numbers<[1], [0], [0], [1], [0, 0, 1, 1], [], []>} : vector<8x128xbf16>, vector<128x128xbf16>, vector<8x128xf32> -> vector<8x128xf32>
    %c0_15 = arith.constant 0 : index
    %c0_16 = arith.constant 0 : index
    %20 = vector.load %arg7[%c0_15, %c0_16] : memref<1x128xf32, #tpu.memory_space<vmem>>, vector<1x128xf32>
    %21 = vector.broadcast %20 : vector<1x128xf32> to vector<8x128xf32>
    %22 = arith.addf %19, %21 : vector<8x128xf32>
    %cst_17 = arith.constant 0.000000e+00 : f32
    %23 = vector.broadcast %cst_17 : f32 to vector<8x128xf32>
    %24 = arith.maximumf %22, %23 : vector<8x128xf32>
    %25 = arith.truncf %24 : vector<8x128xf32> to vector<8x128xbf16>
    %c0_18 = arith.constant 0 : index
    %c0_19 = arith.constant 0 : index
    %26 = vector.load %arg8[%c0_18, %c0_19] : memref<128x128xbf16, #tpu.memory_space<vmem>>, vector<128x128xbf16>
    %cst_20 = arith.constant dense<0.000000e+00> : vector<8x128xf32>
    %27 = tpu.matmul %25, %26, %cst_20 {dimension_numbers = #tpu.dot_dimension_numbers<[1], [0], [0], [1], [0, 0, 1, 1], [], []>} : vector<8x128xbf16>, vector<128x128xbf16>, vector<8x128xf32> -> vector<8x128xf32>
    %c0_21 = arith.constant 0 : index
    %c0_22 = arith.constant 0 : index
    %28 = vector.load %arg9[%c0_21, %c0_22] : memref<1x128xf32, #tpu.memory_space<vmem>>, vector<1x128xf32>
    %29 = vector.broadcast %28 : vector<1x128xf32> to vector<8x128xf32>
    %30 = arith.addf %27, %29 : vector<8x128xf32>
    %c0_23 = arith.constant 0 : index
    %c0_24 = arith.constant 0 : index
    %31 = vector.load %arg10[%c0_23, %c0_24] : memref<8x128xf32, #tpu.memory_space<vmem>>, vector<8x128xf32>
    tpu.vector_store %arg10[%c0_23, %c0_24], %30 {strides = array<i32>} : memref<8x128xf32, #tpu.memory_space<vmem>>, vector<8x128xf32>,
    return
  }
  func.func @transform_0(%arg0: i32) -> (i32, i32) {
    %c0_i32 = arith.constant 0 : i32
    %c0_i32_0 = arith.constant 0 : i32
    return %arg0, %c0_i32 : i32, i32
  }
  func.func @transform_1(%arg0: i32) -> (i32, i32) {
    %c0_i32 = arith.constant 0 : i32
    %c0_i32_0 = arith.constant 0 : i32
    %c0_i32_1 = arith.constant 0 : i32
    return %c0_i32, %c0_i32_0 : i32, i32
  }
  func.func @transform_2(%arg0: i32) -> (i32, i32) {
    %c0_i32 = arith.constant 0 : i32
    %c0_i32_0 = arith.constant 0 : i32
    %c0_i32_1 = arith.constant 0 : i32
    return %c0_i32, %c0_i32_0 : i32, i32
  }
  func.func @transform_3(%arg0: i32) -> (i32, i32) {
    %c0_i32 = arith.constant 0 : i32
    %c0_i32_0 = arith.constant 0 : i32
    %c0_i32_1 = arith.constant 0 : i32
    return %c0_i32, %c0_i32_0 : i32, i32
  }
  func.func @transform_4(%arg0: i32) -> (i32, i32) {
    %c0_i32 = arith.constant 0 : i32
    %c0_i32_0 = arith.constant 0 : i32
    %c0_i32_1 = arith.constant 0 : i32
    return %c0_i32, %c0_i32_0 : i32, i32
  }
  func.func @transform_5(%arg0: i32) -> (i32, i32) {
    %c0_i32 = arith.constant 0 : i32
    %c0_i32_0 = arith.constant 0 : i32
    %c0_i32_1 = arith.constant 0 : i32
    return %c0_i32, %c0_i32_0 : i32, i32
  }
  func.func @transform_6(%arg0: i32) -> (i32, i32) {
    %c0_i32 = arith.constant 0 : i32
    %c0_i32_0 = arith.constant 0 : i32
    %c0_i32_1 = arith.constant 0 : i32
    return %c0_i32, %c0_i32_0 : i32, i32
  }
  func.func @transform_7(%arg0: i32) -> (i32, i32) {
    %c0_i32 = arith.constant 0 : i32
    %c0_i32_0 = arith.constant 0 : i32
    %c0_i32_1 = arith.constant 0 : i32
    return %c0_i32, %c0_i32_0 : i32, i32
  }
  func.func @transform_8(%arg0: i32) -> (i32, i32) {
    %c0_i32 = arith.constant 0 : i32
    %c0_i32_0 = arith.constant 0 : i32
    %c0_i32_1 = arith.constant 0 : i32
    return %c0_i32, %c0_i32_0 : i32, i32
  }
  func.func @transform_9(%arg0: i32) -> (i32, i32) {
    %c0_i32 = arith.constant 0 : i32
    %c0_i32_0 = arith.constant 0 : i32
    return %arg0, %c0_i32 : i32, i32
  }
}

</mosaic_0001>

<bundles_post_ra>
// kernel: tpu_custom_call.1
= control target key start
LH: loop header
LB: loop body
LE: loop exit
PB: predicated region body
PF: predicated region fallthrough
CT: control target
= control target key end

     0   :  { %14 = vsyncpa [#allocation3], 0  ;;  %s873_s0 = inlined_call_operand.hbm [shape: f32[8,128], index: 0, kind: input, shape index: {}]   ;;  %s874_s1 = inlined_call_operand.hbm [shape: bf16[128,128], index: 1, kind: input, shape index: {}]   ;;  %s875_s2 = inlined_call_operand.vmem [shape: f32[1,128], index: 2, kind: input, shape index: {}]   ;;  %s876_s3 = inlined_call_operand.hbm [shape: bf16[128,128], index: 3, kind: input, shape index: {}]   ;;  %s877_s4 = inlined_call_operand.vmem [shape: f32[1,128], index: 4, kind: input, shape index: {}]   ;;  %s878_s5 = inlined_call_operand.hbm [shape: bf16[128,128], index: 5, kind: input, shape index: {}]   ;;  %s879_s6 = inlined_call_operand.vmem [shape: f32[1,128], index: 6, kind: input, shape index: {}]   ;;  %s880_s7 = inlined_call_operand.hbm [shape: bf16[128,128], index: 7, kind: input, shape index: {}]   ;;  %s881_s8 = inlined_call_operand.vmem [shape: f32[1,128], index: 8, kind: input, shape index: {}]   ;;  %s882_s9 = inlined_call_operand.hbm [shape: f32[8,128], index: 9, kind: output, shape index: {}]  }
   0x1   :  { %15 = vsyncpa [#allocation6], 0 }
   0x2   :  { %16 = vsyncpa [#allocation9], 0  ;;  %s33_s11 = sshll.u32 %s874_s1, 4  ;;  %s34_s11 = int_to_ptr.hbm [resolvable:$true] %s33_s11 }
   0x3   :  { %17 = vsyncpa [#allocation4], 0  ;;  %s785_s12 = smov [#allocation5]   ;;  %s63_s16 = sshll.u32 %s878_s5, 4  ;;  %s64_s16 = int_to_ptr.hbm [resolvable:$true] %s63_s16 }
   0x4   :  { %s35_s13 = sshll.u32 %s785_s12, 4  ;;  %s786_s17 = smov 64   ;;  %s36_s13 = int_to_ptr.vmem [resolvable:$true] %s35_s13 }
   0x5   :  { %s787_s18 = smov 4   ;;  %s788_s19 = smov [#allocation8]  }
   0x6   :  { %41 = dma.hbm_to_vmem [thread:$0]  %s34_s11, 1024, %s36_s13, [#allocation6], %s786_s17, %s786_s17, %s787_s18  }
   0x7   :  { %s65_s20 = sshll.u32 %s788_s19, 4  ;;  %s23_s23 = sshll.u32 %s873_s0, 4  ;;  %s66_s20 = int_to_ptr.vmem [resolvable:$true] %s65_s20  ;;  %s24_s23 = int_to_ptr.hbm [resolvable:$true] %s23_s23 }
   0x8   :  { %71 = dma.hbm_to_vmem [thread:$0]  %s64_s16, 1024, %s66_s20, [#allocation9], %s786_s17, %s786_s17, %s787_s18  }
   0x9   :  { %s48_s25 = sshll.u32 %s876_s3, 4  ;;  %s789_s26 = smov [#allocation2]   ;;  %s49_s25 = int_to_ptr.hbm [resolvable:$true] %s48_s25 }
   0xa   :  { %s25_s27 = sshll.u32 %s789_s26, 4  ;;  %s790_s5 = smov [#allocation7]   ;;  %s26_s27 = int_to_ptr.vmem [resolvable:$true] %s25_s27 }
   0xb   :  { %28 = dma.hbm_to_vmem [thread:$0]  %s24_s23, 128, %s26_s27, [#allocation3]  }
   0xc   :  { %s50_s28 = sshll.u32 %s790_s5, 4  ;;  %s78_s10 = sshll.u32 %s880_s7, 4  ;;  %s51_s28 = int_to_ptr.vmem [resolvable:$true] %s50_s28  ;;  %s79_s10 = int_to_ptr.hbm [resolvable:$true] %s78_s10 }
   0xd   :  { %56 = dma.hbm_to_vmem [thread:$0]  %s49_s25, 1024, %s51_s28, [#allocation6], %s786_s17, %s786_s17, %s787_s18  }
   0xe   :  { %s791_s0 = smov [#allocation10]  }
   0xf   :  { %s80_s11 = sshll.u32 %s791_s0, 4  ;;  %s81_s11 = int_to_ptr.vmem [resolvable:$true] %s80_s11 }
  0x10   :  { %86 = dma.hbm_to_vmem [thread:$0]  %s79_s10, 1024, %s81_s11, [#allocation9], %s786_s17, %s786_s17, %s787_s18  }
  0x11   :  { %777 = dma.done.wait [#allocation3], 128  }
  0x12   :  { %778 = vsyncadd [#allocation3], 4294967168 }
  0x13   :  { %779 = dma.done.wait [#allocation6], 2048  }
  0x14   :  { %780 = vsyncadd [#allocation6], 4294965248 }
  0x15   :  { %781 = dma.done.wait [#allocation9], 2048  }
  0x16   :  { %782 = vsyncadd [#allocation9], 4294965248  ;;  %v596_v0 = vld [vmem:[#allocation5 + $0x38] sm:$0xff]  ;;  %v595_v1 = vld [vmem:[#allocation5 + $0x30] sm:$0xff]  ;;  %s792_s16 = smov [#allocation11]   ;;  %s449_s20 = sshll.u32 %s882_s9, 4  ;;  %s450_s20 = int_to_ptr.hbm [resolvable:$true] %s449_s20 }
  0x17   :  { %179 = vmatpush.bf16.msra.mxu0 %v596_v0  ;;  %v604_v2 = vld [vmem:[#allocation7 + $0x38] sm:$0xff]  ;;  %v603_v3 = vld [vmem:[#allocation7 + $0x30] sm:$0xff]  ;;  %v594_v4 = vld [vmem:[#allocation5 + $0x28] sm:$0xff]  ;;  %s447_s17 = sshll.u32 %s792_s16, 4  ;;  %s448_s17 = int_to_ptr.vmem [resolvable:$true] %s447_s17 }
  0x18   :  { %262 = vmatpush.bf16.msra.mxu1 %v604_v2  ;;  %v602_v5 = vld [vmem:[#allocation7 + $0x28] sm:$0xff]  ;;  %v593_v6 = vld [vmem:[#allocation5 + $0x20] sm:$0xff]  ;;  %v592_v8 = vld [vmem:[#allocation5 + $0x18] sm:$0xff] }
  0x19   :  { %v601_v7 = vld [vmem:[#allocation7 + $0x20] sm:$0xff]  ;;  %v600_v9 = vld [vmem:[#allocation7 + $0x18] sm:$0xff]  ;;  %v591_v10 = vld [vmem:[#allocation5 + $0x10] sm:$0xff] }
  0x1a   :  { %v599_v11 = vld [vmem:[#allocation7 + $0x10] sm:$0xff]  ;;  %v590_v12 = vld [vmem:[#allocation5 + $0x8] sm:$0xff]  ;;  %v589_v13 = vld [vmem:[#allocation5] sm:$0xff] }
  0x1b   :  { %180 = vmatpush.bf16.msra.mxu0 %v595_v1  ;;  %v109_v14 = vld [vmem:[#allocation2] sm:$0xff]  ;;  %v598_v16 = vld [vmem:[#allocation7 + $0x8] sm:$0xff]  ;;  %v597_v17 = vld [vmem:[#allocation7] sm:$0xff] }
  0x1c   :  { %263 = vmatpush.bf16.msra.mxu1 %v603_v3  ;;  %v110_v15 = vpack.c.bf16 %v109_v14, %v109_v14  ;;  %v612_v18 = vld [vmem:[#allocation8 + $0x38] sm:$0xff]  ;;  %v611_v19 = vld [vmem:[#allocation8 + $0x30] sm:$0xff]  ;;  %v610_v20 = vld [vmem:[#allocation8 + $0x28] sm:$0xff] }
  0x1d   :  { %345 = vmatpush.bf16.msra.mxu2 %v612_v18  ;;  %v609_v21 = vld [vmem:[#allocation8 + $0x20] sm:$0xff]  ;;  %v608_v22 = vld [vmem:[#allocation8 + $0x18] sm:$0xff]  ;;  %v607_v23 = vld [vmem:[#allocation8 + $0x10] sm:$0xff] }
  0x1e   :  { %v629_v24 = vld [vmem:[%s875_s2] ss:$0 sm:$0xff]  ;;  %v606_v30 = vld [vmem:[#allocation8 + $0x8] sm:$0xff]  ;;  %v605_v31 = vld [vmem:[#allocation8] sm:$0xff] }
  0x1f   :  { %181 = vmatpush.bf16.msra.mxu0 %v594_v4  ;;  %v620_v32 = vld [vmem:[#allocation10 + $0x38] sm:$0xff]  ;;  %v619_v33 = vld [vmem:[#allocation10 + $0x30] sm:$0xff]  ;;  %v618_v34 = vld [vmem:[#allocation10 + $0x28] sm:$0xff] }
  0x20   :  { %264 = vmatpush.bf16.msra.mxu1 %v602_v5  ;;  %428 = vmatpush.bf16.msra.mxu3 %v620_v32  ;;  %v617_v35 = vld [vmem:[#allocation10 + $0x20] sm:$0xff]  ;;  %v616_v36 = vld [vmem:[#allocation10 + $0x18] sm:$0xff]  ;;  %v615_v37 = vld [vmem:[#allocation10 + $0x10] sm:$0xff] }
  0x21   :  { %346 = vmatpush.bf16.msra.mxu2 %v611_v19  ;;  %v630_v38 = vld [vmem:[%s877_s4] ss:$0 sm:$0xff]  ;;  %v614_v44 = vld [vmem:[#allocation10 + $0x8] sm:$0xff]  ;;  %v613_v45 = vld [vmem:[#allocation10] sm:$0xff] }
  0x22   :  { %v631_v46 = vld [vmem:[%s879_s6] ss:$0 sm:$0xff] }
  0x23   :  { %182 = vmatpush.bf16.msra.mxu0 %v593_v6  ;;  %v632_v52 = vld [vmem:[%s881_s8] ss:$0 sm:$0xff] }
  0x24   :  { %265 = vmatpush.bf16.msra.mxu1 %v601_v7  ;;  %429 = vmatpush.bf16.msra.mxu3 %v619_v33 }
  0x25   :  { %347 = vmatpush.bf16.msra.mxu2 %v610_v20 }
  0x27   :  { %183 = vmatpush.bf16.msra.mxu0 %v592_v8 }
  0x28   :  { %266 = vmatpush.bf16.msra.mxu1 %v600_v9  ;;  %430 = vmatpush.bf16.msra.mxu3 %v618_v34 }
  0x29   :  { %348 = vmatpush.bf16.msra.mxu2 %v609_v21 }
  0x2b   :  { %184 = vmatpush.bf16.msra.mxu0 %v591_v10 }
  0x2c   :  { %267 = vmatpush.bf16.msra.mxu1 %v599_v11  ;;  %431 = vmatpush.bf16.msra.mxu3 %v617_v35 }
  0x2d   :  { %349 = vmatpush.bf16.msra.mxu2 %v608_v22 }
  0x2f   :  { %185 = vmatpush.bf16.msra.mxu0 %v590_v12 }
  0x30   :  { %268 = vmatpush.bf16.msra.mxu1 %v598_v16  ;;  %432 = vmatpush.bf16.msra.mxu3 %v616_v36 }
  0x31   :  { %350 = vmatpush.bf16.msra.mxu2 %v607_v23 }
  0x33   :  { %186 = vmatpush.bf16.msra.mxu0 %v589_v13 }
  0x34   :  { %269 = vmatpush.bf16.msra.mxu1 %v597_v17  ;;  %433 = vmatpush.bf16.msra.mxu3 %v615_v37 }
  0x35   :  { %351 = vmatpush.bf16.msra.mxu2 %v606_v30 }
  0x36   :  { %187 = vmatmul.bf16.vlgmr.msra.gmra.mxu0 %v110_v15 }
  0x38   :  { %434 = vmatpush.bf16.msra.mxu3 %v614_v44 }
  0x39   :  { %352 = vmatpush.bf16.msra.mxu2 %v605_v31 }
  0x3c   :  { %435 = vmatpush.bf16.msra.mxu3 %v613_v45 }
  0xb3   :  { %v188_v25 = vpop.f32.mrf.mxu0 }
  0xb4   :  { %v189_v26 = vadd.f32 %v629_v24, %v188_v25 }
  0xb6   :  { %v192_v27 = vmax.f32 %v189_v26, 0.0 }
  0xb8   :  { %v193_v28 = vpack.c.bf16 %v192_v27, %v192_v27 }
  0xba   :  { %270 = vmatmul.bf16.vlgmr.msra.gmra.mxu1 %v193_v28 }
  0xbb   :  { %v190_v29 = vpop.f32.mrf.mxu0 }
 0x137   :  { %v271_v39 = vpop.f32.mrf.mxu1 }
 0x138   :  { %v272_v40 = vadd.f32 %v630_v38, %v271_v39 }
 0x13a   :  { %v275_v41 = vmax.f32 %v272_v40, 0.0 }
 0x13c   :  { %v276_v42 = vpack.c.bf16 %v275_v41, %v275_v41 }
 0x13e   :  { %353 = vmatmul.bf16.vlgmr.msra.gmra.mxu2 %v276_v42 }
 0x13f   :  { %v273_v43 = vpop.f32.mrf.mxu1 }
 0x1c1   :  { %v354_v47 = vpop.f32.mrf.mxu2 }
 0x1c2   :  { %v355_v48 = vadd.f32 %v631_v46, %v354_v47 }
 0x1c4   :  { %v358_v49 = vmax.f32 %v355_v48, 0.0 }
 0x1c6   :  { %v359_v50 = vpack.c.bf16 %v358_v49, %v358_v49 }
 0x1c8   :  { %436 = vmatmul.bf16.vlgmr.msra.gmra.mxu3 %v359_v50 }
 0x1c9   :  { %v356_v51 = vpop.f32.mrf.mxu2 }
 0x24b   :  { %v437_v53 = vpop.f32.mrf.mxu3 }
 0x24c   :  { %v438_v54 = vadd.f32 %v632_v52, %v437_v53 }
 0x24e   :  { %441 = vst [vmem:[#allocation11] sm:$0xff] %v438_v54 }
 0x24f   :  { %452 = dma.vmem_to_hbm [thread:$0]  %s448_s17, 128, %s450_s20, [#allocation4]  }
 0x253   :  { %v439_v55 = vpop.f32.mrf.mxu3 }
 0x254   :  { %783 = dma.done.wait [#allocation4], 128  }
 0x255   :  { %784 = vsyncadd [#allocation4], 4294967168 }
 0x256   :  { %457 = vsyncpa [#allocation3], 1 }
 0x257   :  { %458 = vsyncpa [#allocation6], 1 }
 0x258   :  { %459 = vsyncpa [#allocation9], 1 }
 0x259   :  { %460 = vsyncpa [#allocation4], 1 }

</bundles_post_ra>
